<compile_context>
chip_gen: v7x
topology: tpu7x:2x2x1
jax: 0.10.0
libtpu: 0.0.40
codegen_flags: <defaults>
</compile_context>

<pallas_src>
import functools

import jax
import jax.numpy as jnp
from jax import lax
from jax.experimental import pallas as pl
from jax.experimental.pallas import tpu as pltpu

_LANES = 128
_SUBLANES = 8
_TILED_VMEM_LIMIT = 32 << 20


# ---------------------------------------------------------------------------
# Generation-dependent defaults
# ---------------------------------------------------------------------------
def _device_kind():
    try:
        return jax.devices()[0].device_kind.lower()
    except Exception:
        return ""


def _default_tile_rows():
    kind = _device_kind()
    if any(v in kind for v in ("v2", "v3", "v4", "v5")):
        return 1024           # ~0.5 MiB tiles already sit at the <=1.4 TB/s roofline
    if "v6" in kind:
        return 2048           # ~1 MiB tiles amortize the ~0.35us per-step overhead
    return 4096               # v7x (3.2 TB/s/TC): bigger tiles, ~8 MiB pipeline VMEM


def _num_tensorcores():
    kind = _device_kind()
    return 2 if "v7" in kind else 1     # v7x: 2 TensorCores share the chip's HBM


def _small_path_limits():
    """(max rows per f32 slab, vmem_limit_bytes) for the single-block path."""
    kind = _device_kind()
    if "v7" in kind:
        return 24576, 40 << 20          # 2 x 12 MiB slabs, 64 MiB physical VMEM
    return 32768, 48 << 20              # 2 x 16 MiB slabs, 128 MiB physical VMEM


# ---------------------------------------------------------------------------
# Shared helpers
# ---------------------------------------------------------------------------
def _valid_mask(shape, row_offset, n_valid):
    """True where (row_offset+r)*128 + c < n_valid, via row/col comparison
    (avoids 32-bit flat-index overflow for huge inputs)."""
    full_rows = n_valid // _LANES
    rem = n_valid % _LANES
    r = lax.broadcasted_iota(jnp.int32, shape, 0) + row_offset
    c = lax.broadcasted_iota(jnp.int32, shape, 1)
    return (r < full_rows) | ((r == full_rows) & (c < rem))


def _refined_recip(x):
    # EUP approx reciprocal + one Newton step (VPU) -> ~f32 accuracy.
    r = pl.reciprocal(x, approx=True)
    return r * (jnp.float32(2.0) - x * r)


def _fold_rows(x, op):
    """(rows,128) -> (8,128) partial reduction using VPU-only ops (no XLU)."""
    rows = x.shape[0]
    g = rows // _SUBLANES
    if g == 1:
        return x
    return op(x.reshape(g, _SUBLANES, _LANES), axis=0)


# ---------------------------------------------------------------------------
# Single-block kernel (whole slab resident in VMEM)
# ---------------------------------------------------------------------------
def _mycost2_small_kernel(v1_ref, v2_ref, out_ref, *, n_valid, needs_mask):
    v1 = v1_ref[...].astype(jnp.float32)
    v2 = v2_ref[...].astype(jnp.float32)

    if needs_mask:
        valid = _valid_mask(v1.shape, 0, n_valid)
        v1_min = jnp.min(_fold_rows(jnp.where(valid, v1, jnp.inf), jnp.min))
    else:
        v1_min = jnp.min(_fold_rows(v1, jnp.min))
    # Slab is zero padded, so padding contributes nothing to the sum.
    v1_sum = jnp.sum(_fold_rows(v1, jnp.sum))

    shift = jnp.float32(0.01) - v1_min
    s_total = v1_sum + jnp.float32(n_valid) * shift          # == sum(v1')

    v1p = v1 + shift
    if needs_mask:
        v1p = jnp.where(valid, v1p, jnp.float32(1.0))        # recip-safe padding
    contrib = v2 * _refined_recip(v1p)                       # padded v2 == 0
    out_ref[0, 0] = s_total * jnp.sum(_fold_rows(contrib, jnp.sum))


# ---------------------------------------------------------------------------
# Tiled two-pass streaming kernels (per-core partial accumulators)
# ---------------------------------------------------------------------------
def _mycost2_pass1_kernel(v1_ref, min_ref, sum_ref, *, tile_rows,
                          tiles_per_core, num_tiles, n_valid,
                          needs_mask, has_skip):
    c = pl.program_id(0)
    i = pl.program_id(1)
    tile_idx = c * tiles_per_core + i

    @pl.when(i == 0)
    def _init():
        min_ref[0] = jnp.full((_SUBLANES, _LANES), jnp.inf, jnp.float32)
        sum_ref[0] = jnp.zeros((_SUBLANES, _LANES), jnp.float32)

    v1 = v1_ref[...].astype(jnp.float32)

    def unmasked():
        min_ref[0] = jnp.minimum(min_ref[0], _fold_rows(v1, jnp.min))
        sum_ref[0] = sum_ref[0] + _fold_rows(v1, jnp.sum)

    def masked():
        valid = _valid_mask(v1.shape, tile_idx * tile_rows, n_valid)
        min_ref[0] = jnp.minimum(
            min_ref[0], _fold_rows(jnp.where(valid, v1, jnp.inf), jnp.min))
        sum_ref[0] = sum_ref[0] + _fold_rows(jnp.where(valid, v1, 0.0), jnp.sum)

    last = num_tiles - 1
    if needs_mask:
        pl.when(tile_idx < last)(unmasked)      # steady state: no iota/where work
        pl.when(tile_idx == last)(masked)       # only the final ragged tile
    elif has_skip:
        pl.when(tile_idx <= last)(unmasked)     # skip over-shoot tiles of last core
    else:
        unmasked()


def _mycost2_pass2_kernel(shift_ref, v1_ref, v2_ref, acc_ref, *, tile_rows,
                          tiles_per_core, num_tiles, n_valid,
                          needs_mask, has_skip):
    c = pl.program_id(0)
    i = pl.program_id(1)
    tile_idx = c * tiles_per_core + i

    @pl.when(i == 0)
    def _init():
        acc_ref[0] = jnp.zeros((_SUBLANES, _LANES), jnp.float32)

    shift = shift_ref[0]
    v1p = v1_ref[...].astype(jnp.float32) + shift
    v2 = v2_ref[...].astype(jnp.float32)

    def unmasked():
        acc_ref[0] = acc_ref[0] + _fold_rows(v2 * _refined_recip(v1p), jnp.sum)

    def masked():
        valid = _valid_mask(v1p.shape, tile_idx * tile_rows, n_valid)
        safe = jnp.where(valid, v1p, jnp.float32(1.0))       # recip-safe padding
        contrib = jnp.where(valid, v2 * _refined_recip(safe), 0.0)
        acc_ref[0] = acc_ref[0] + _fold_rows(contrib, jnp.sum)

    last = num_tiles - 1
    if needs_mask:
        pl.when(tile_idx < last)(unmasked)
        pl.when(tile_idx == last)(masked)
    elif has_skip:
        pl.when(tile_idx <= last)(unmasked)
    else:
        unmasked()


# ---------------------------------------------------------------------------
# Wrapper
# ---------------------------------------------------------------------------
def _round_up(x, m):
    return (x + m - 1) // m * m


def _to_slab(x, rows):
    """Reshape flat data into a (rows,128) slab; pads with zeros only when the
    element count is not already rows*128 (plain reshape is free)."""
    flat = jnp.ravel(x)
    pad = rows * _LANES - flat.shape[0]
    if pad:
        # TODO(synk): for very large ragged inputs, split into an aligned prefix
        # plus a tiny padded tail instead of jnp.pad-copying the whole array.
        flat = jnp.pad(flat, (0, pad))
    return flat.reshape(rows, _LANES)


def mycost2(v1, v2, *, tile_rows=None, num_cores=None, force_tiled=False):
    """Pallas TPU implementation of mycost2.forward(v1, v2) -> scalar."""
    assert v1.shape == v2.shape, "v1 and v2 must have the same shape"
    n = int(v1.size)
    assert n > 0
    min_rows = pl.cdiv(n, _LANES)
    rows = _round_up(min_rows, _SUBLANES)

    small_max_rows, small_vmem = _small_path_limits()
    if not force_tiled and rows <= small_max_rows:
        # -------- single whole-slab VMEM block: each input read from HBM once.
        needs_mask = rows * _LANES != n
        v1s = _to_slab(v1, rows)
        v2s = _to_slab(v2, rows)
        out = pl.pallas_call(
            functools.partial(_mycost2_small_kernel,
                              n_valid=n, needs_mask=needs_mask),
            out_shape=jax.ShapeDtypeStruct((1, 1), jnp.float32),
            in_specs=[pl.BlockSpec(memory_space=pltpu.VMEM),
                      pl.BlockSpec(memory_space=pltpu.VMEM)],
            out_specs=pl.BlockSpec(memory_space=pltpu.SMEM),
            compiler_params=pltpu.CompilerParams(vmem_limit_bytes=small_vmem),
        )(v1s, v2s)
        return out[0, 0]

    # TODO(synk): add a hybrid path (v1 resident in VMEM, v2 streamed) for sizes
    # where v1 alone fits in VMEM -> cuts HBM traffic from 3N*4 to 2N*4 bytes.

    # -------- tiled two-pass streaming path (optionally split across 2 TCs) ----
    tile_rows = int(tile_rows) if tile_rows is not None else _default_tile_rows()
    assert tile_rows % _SUBLANES == 0
    num_cores = int(num_cores) if num_cores is not None else _num_tensorcores()

    num_tiles = pl.cdiv(rows, tile_rows)
    tiles_per_core = pl.cdiv(num_tiles, num_cores)
    has_skip = num_cores * tiles_per_core != num_tiles
    needs_mask = num_tiles * tile_rows * _LANES != n

    v1s = _to_slab(v1, rows)
    v2s = _to_slab(v2, rows)

    if has_skip:
        def _blk(c, i):
            return (jnp.minimum(c * tiles_per_core + i, num_tiles - 1), 0)
    else:
        def _blk(c, i):
            return (c * tiles_per_core + i, 0)

    acc_spec = pl.BlockSpec((1, _SUBLANES, _LANES), lambda c, i: (c, 0, 0))
    acc_shape = jax.ShapeDtypeStruct((num_cores, _SUBLANES, _LANES), jnp.float32)
    tiled_params = pltpu.CompilerParams(
        dimension_semantics=("parallel", "arbitrary"),
        vmem_limit_bytes=_TILED_VMEM_LIMIT)
    kern_kwargs = dict(tile_rows=tile_rows, tiles_per_core=tiles_per_core,
                       num_tiles=num_tiles, n_valid=n,
                       needs_mask=needs_mask, has_skip=has_skip)

    # Pass 1: per-core (8,128) partial min/sum of v1 (only v1 is streamed).
    min_p, sum_p = pl.pallas_call(
        functools.partial(_mycost2_pass1_kernel, **kern_kwargs),
        out_shape=(acc_shape, acc_shape),
        grid=(num_cores, tiles_per_core),
        in_specs=[pl.BlockSpec((tile_rows, _LANES), _blk)],
        out_specs=(acc_spec, acc_spec),
        compiler_params=tiled_params,
    )(v1s)

    v1_min = jnp.min(min_p)
    v1_sum = jnp.sum(sum_p)
    shift = jnp.float32(0.01) - v1_min
    s_total = v1_sum + jnp.float32(n) * shift            # == sum(v1')

    # Pass 2: per-core partial sum of v2 * recip(v1 + shift).
    acc_p = pl.pallas_call(
        functools.partial(_mycost2_pass2_kernel, **kern_kwargs),
        out_shape=acc_shape,
        grid=(num_cores, tiles_per_core),
        in_specs=[pl.BlockSpec(memory_space=pltpu.SMEM),
                  pl.BlockSpec((tile_rows, _LANES), _blk),
                  pl.BlockSpec((tile_rows, _LANES), _blk)],
        out_specs=acc_spec,
        compiler_params=tiled_params,
    )(jnp.reshape(shift, (1,)).astype(jnp.float32), v1s, v2s)

    # TODO(synk): optionally fuse pass 1 + pass 2 into one pallas_call with a
    # leading phase axis to save one launch and the stats round-trip.
    return s_total * jnp.sum(acc_p)


def _reference(v1, v2):
    v1 = v1.astype(jnp.float32)
    v2 = v2.astype(jnp.float32)
    v1 = v1 + 0.01 - jnp.min(v1)
    v1 = v1 / jnp.sum(v1)
    return jnp.sum(v2 * (1.0 / v1))


if __name__ == "__main__":
    key = jax.random.PRNGKey(0)
    k1, k2, k3, k4, k5, k6 = jax.random.split(key, 6)

    # 1) Small (single whole-slab) path.
    v1 = jax.random.uniform(k1, (2, 4, 16, 16), dtype=jnp.float32) + 0.5
    v2 = jax.random.uniform(k2, (2, 4, 16, 16), dtype=jnp.float32)
    out = mycost2(v1, v2)
    jax.block_until_ready(out)
    ref = _reference(v1, v2)
    assert jnp.allclose(out, ref, rtol=1e-4, atol=1e-3), (out, ref)

    # 2) Tiled streaming path: dual-core split with an uneven tile count
    #    (exercises the over-shoot skip logic).
    v1b = jax.random.uniform(k3, (3, 4, 16, 16), dtype=jnp.float32) + 0.5
    v2b = jax.random.uniform(k4, (3, 4, 16, 16), dtype=jnp.float32)
    out_b = mycost2(v1b, v2b, force_tiled=True, tile_rows=8, num_cores=2)
    jax.block_until_ready(out_b)
    ref_b = _reference(v1b, v2b)
    assert jnp.allclose(out_b, ref_b, rtol=1e-4, atol=1e-3), (out_b, ref_b)

    # 3) Ragged shape: small masked path and tiled path with masked final tile.
    v1c = jax.random.uniform(k5, (3, 5, 7, 11), dtype=jnp.float32) + 0.5
    v2c = jax.random.uniform(k6, (3, 5, 7, 11), dtype=jnp.float32)
    ref_c = _reference(v1c, v2c)
    out_c = mycost2(v1c, v2c)
    jax.block_until_ready(out_c)
    assert jnp.allclose(out_c, ref_c, rtol=1e-4, atol=1e-3), (out_c, ref_c)
    out_ct = mycost2(v1c, v2c, force_tiled=True, tile_rows=8, num_cores=2)
    jax.block_until_ready(out_ct)
    assert jnp.allclose(out_ct, ref_c, rtol=1e-4, atol=1e-3), (out_ct, ref_c)

    print("KERNEL_OK")
</pallas_src>

<mosaic_0001>
module attributes {stable_mosaic.version = 11 : i64} {
  func.func @_mycost2_small_kernel(%arg0: memref<16x128xf32, #tpu.memory_space<vmem>>, %arg1: memref<16x128xf32, #tpu.memory_space<vmem>>, %arg2: memref<1x1xf32, #tpu.memory_space<smem>>) attributes {dimension_semantics = [], scalar_prefetch = 0 : i64, scratch_operands = 0 : i64, tpu.core_type = #tpu.core_type<tc>} {
    %c0 = arith.constant 0 : index
    %c0_0 = arith.constant 0 : index
    %0 = vector.load %arg0[%c0, %c0_0] : memref<16x128xf32, #tpu.memory_space<vmem>>, vector<16x128xf32>
    %c0_1 = arith.constant 0 : index
    %c0_2 = arith.constant 0 : index
    %1 = vector.load %arg1[%c0_1, %c0_2] : memref<16x128xf32, #tpu.memory_space<vmem>>, vector<16x128xf32>
    %2 = vector.shape_cast %0 : vector<16x128xf32> to vector<2x8x128xf32>
    %cst = arith.constant dense<0x7F800000> : vector<8x128xf32>
    %3 = vector.multi_reduction <minimumf>, %2, %cst [0] : vector<2x8x128xf32> to vector<8x128xf32>
    %4 = vector.shape_cast %3 : vector<8x128xf32> to vector<1x8x128xf32>
    %cst_3 = arith.constant dense<0x7F800000> : vector<1xf32>
    %5 = vector.multi_reduction <minimumf>, %4, %cst_3 [1, 2] : vector<1x8x128xf32> to vector<1xf32>
    %6 = vector.shape_cast %5 : vector<1xf32> to vector<1x1x1xf32>
    %7 = vector.extract %6[0, 0, 0] : f32 from vector<1x1x1xf32>
    %8 = vector.shape_cast %0 : vector<16x128xf32> to vector<2x8x128xf32>
    %cst_4 = arith.constant dense<0.000000e+00> : vector<8x128xf32>
    %9 = vector.multi_reduction <add>, %8, %cst_4 [0] : vector<2x8x128xf32> to vector<8x128xf32>
    %10 = vector.shape_cast %9 : vector<8x128xf32> to vector<1x8x128xf32>
    %cst_5 = arith.constant dense<0.000000e+00> : vector<1xf32>
    %11 = vector.multi_reduction <add>, %10, %cst_5 [1, 2] : vector<1x8x128xf32> to vector<1xf32>
    %12 = vector.shape_cast %11 : vector<1xf32> to vector<1x1x1xf32>
    %13 = vector.extract %12[0, 0, 0] : f32 from vector<1x1x1xf32>
    %cst_6 = arith.constant 0.00999999977 : f32
    %14 = arith.subf %cst_6, %7 : f32
    %cst_7 = arith.constant 2.048000e+03 : f32
    %15 = arith.mulf %cst_7, %14 : f32
    %16 = arith.addf %13, %15 : f32
    %17 = vector.broadcast %14 : f32 to vector<16x128xf32>
    %18 = arith.addf %0, %17 : vector<16x128xf32>
    %19 = tpu.reciprocal %18 {approx = true} : vector<16x128xf32> -> vector<16x128xf32>
    %20 = arith.mulf %18, %19 : vector<16x128xf32>
    %cst_8 = arith.constant 2.000000e+00 : f32
    %21 = vector.broadcast %cst_8 : f32 to vector<16x128xf32>
    %22 = arith.subf %21, %20 : vector<16x128xf32>
    %23 = arith.mulf %19, %22 : vector<16x128xf32>
    %24 = arith.mulf %1, %23 : vector<16x128xf32>
    %25 = vector.shape_cast %24 : vector<16x128xf32> to vector<2x8x128xf32>
    %cst_9 = arith.constant dense<0.000000e+00> : vector<8x128xf32>
    %26 = vector.multi_reduction <add>, %25, %cst_9 [0] : vector<2x8x128xf32> to vector<8x128xf32>
    %27 = vector.shape_cast %26 : vector<8x128xf32> to vector<1x8x128xf32>
    %cst_10 = arith.constant dense<0.000000e+00> : vector<1xf32>
    %28 = vector.multi_reduction <add>, %27, %cst_10 [1, 2] : vector<1x8x128xf32> to vector<1xf32>
    %29 = vector.shape_cast %28 : vector<1xf32> to vector<1x1x1xf32>
    %30 = vector.extract %29[0, 0, 0] : f32 from vector<1x1x1xf32>
    %31 = arith.mulf %16, %30 : f32
    %c0_11 = arith.constant 0 : index
    %c0_12 = arith.constant 0 : index
    %32 = memref.load %arg2[%c0_11, %c0_12] : memref<1x1xf32, #tpu.memory_space<smem>>
    memref.store %31, %arg2[%c0_11, %c0_12] : memref<1x1xf32, #tpu.memory_space<smem>>
    return
  }
}

</mosaic_0001>

<bundles_post_ra>
// kernel: tpu_custom_call.1
= control target key start
LH: loop header
LB: loop body
LE: loop exit
PB: predicated region body
PF: predicated region fallthrough
CT: control target
= control target key end

     0   :  { %7 = vsyncpa [#allocation3], 0  ;;  %s242_s0 = inlined_call_operand.hbm [shape: f32[16,128], index: 0, kind: input, shape index: {}]   ;;  %s243_s1 = inlined_call_operand.hbm [shape: f32[16,128], index: 1, kind: input, shape index: {}]   ;;  %s244_s2 = inlined_call_operand.hbm [shape: f32[1,1], index: 2, kind: output, shape index: {}]  }
   0x1   :  { %8 = vsyncpa [#allocation6], 0 }
   0x2   :  { %9 = vsyncpa [#allocation4], 0  ;;  %s183_s9 = smov [#allocation2]   ;;  %s123_s13 = scalar_lea.hbm %s242_s0, 256 }
   0x3   :  { %s15_s10 = sshll.u32 %s183_s9, 4  ;;  %p124_p0 = scmp.ne.s32.totalorder %s242_s0, %s123_s13  ;;  %s16_s10 = int_to_ptr.vmem [resolvable:$true] %s15_s10 }
   0x4   :  { %p127_p1 = scmp.lt.u32.totalorder %s123_s13, %s242_s0 }
   0x6   :  { %p129_p2 = pnand %p127_p1, %p124_p0 }
   0x8   :  { %132 = shalt.err (!%p129_p2)
}
   0x9   :  { %s133_s18 = scalar_lea.vmem %s16_s10, 256  ;;  %p138_p4 = scmp.lt.s32.totalorder %s16_s10, %s16_s10 }
   0xa   :  { %p134_p3 = scmp.ne.s32.totalorder %s16_s10, %s133_s18  ;;  %p139_p5 = scmp.lt.s32.totalorder %s133_s18, %s133_s18 }
   0xc   :  { %p140_p6 = por %p139_p5, %p138_p4 }
   0xe   :  { %p141_p7 = pnand %p140_p6, %p134_p3 }
  0x10   :  { %144 = shalt.err (!%p141_p7)
}
  0x11   :  { %s184_s19 = smov 128   ;;  %s185_s20 = smov 8  }
  0x12   :  { %21 = dma.hbm_to_vmem [thread:$0]  %s242_s0, 256, %s16_s10, [#allocation3], %s184_s19, %s184_s19, %s185_s20  }
  0x13   :  { %s186_s23 = smov [#allocation5]   ;;  %s145_s27 = scalar_lea.hbm %s243_s1, 256 }
  0x14   :  { %s27_s24 = sshll.u32 %s186_s23, 4  ;;  %p146_p8 = scmp.ne.s32.totalorder %s243_s1, %s145_s27  ;;  %s28_s24 = int_to_ptr.vmem [resolvable:$true] %s27_s24 }
  0x15   :  { %p149_p9 = scmp.lt.u32.totalorder %s145_s27, %s243_s1 }
  0x17   :  { %p151_p10 = pnand %p149_p9, %p146_p8 }
  0x19   :  { %154 = shalt.err (!%p151_p10)
}
  0x1a   :  { %s155_s4 = scalar_lea.vmem %s28_s24, 256  ;;  %p160_p12 = scmp.lt.s32.totalorder %s28_s24, %s28_s24 }
  0x1b   :  { %p156_p11 = scmp.ne.s32.totalorder %s28_s24, %s155_s4  ;;  %p161_p13 = scmp.lt.s32.totalorder %s155_s4, %s155_s4 }
  0x1d   :  { %p162_p0 = por %p161_p13, %p160_p12 }
  0x1f   :  { %p163_p1 = pnand %p162_p0, %p156_p11 }
  0x21   :  { %166 = shalt.err (!%p163_p1)
}
  0x22   :  { %33 = dma.hbm_to_vmem [thread:$0]  %s243_s1, 256, %s28_s24, [#allocation6], %s184_s19, %s184_s19, %s185_s20  }
  0x23   :  { %177 = dma.done.wait [#allocation3], 256  }
  0x24   :  { %178 = vsyncadd [#allocation3], 4294967040 }
  0x25   :  { %179 = dma.done.wait [#allocation6], 256  }
  0x26   :  { %180 = vsyncadd [#allocation6], 4294967040  ;;  %v40_v0 = vld [vmem:[#allocation2] sm:$0xff]  ;;  %v41_v1 = vld [vmem:[#allocation2 + $0x8] sm:$0xff]  ;;  %s167_s14 = scalar_lea.hbm %s244_s2, 16 }
  0x27   :  { %v44_v2 = vmin.f32 %v40_v0, %v41_v1  ;;  %v54_v3 = vadd.f32 %v41_v1, %v40_v0  ;;  %v42_v26 = vld [vmem:[#allocation5] sm:$0xff]  ;;  %v43_v28 = vld [vmem:[#allocation5 + $0x8] sm:$0xff]  ;;  %p168_p2 = scmp.ne.s32.totalorder %s244_s2, %s167_s14  ;;  %p171_p3 = scmp.lt.u32.totalorder %s167_s14, %s244_s2 }
  0x29   :  { %45 = vmin.xlane.f32.xlu0 %v44_v2  ;;  %p173_p4 = pnand %p171_p3, %p168_p2 }
  0x2d   :  { %55 = vadd.xlane.f32.xlu0 %v54_v3 }
  0xb6   :  { %v46_v4 = vpop.xlane.xlu0 %45 }
  0xb7   :  { %v47_v5 = vrot.slane %v46_v4, 4 }
  0xb9   :  { %v48_v6 = vmin.f32 %v46_v4, %v47_v5 }
  0xba   :  { %v56_v7 = vpop.xlane.xlu0 %55 }
  0xbb   :  { %v49_v8 = vrot.slane %v48_v6, 2  ;;  %v57_v9 = vrot.slane %v56_v7, 4 }
  0xbd   :  { %v58_v10 = vadd.f32 %v57_v9, %v56_v7  ;;  %v50_v11 = vmin.f32 %v48_v6, %v49_v8 }
  0xbf   :  { %v59_v12 = vrot.slane %v58_v10, 2  ;;  %v51_v13 = vrot.slane %v50_v11, 1 }
  0xc1   :  { %v60_v14 = vadd.f32 %v59_v12, %v58_v10  ;;  %v52_v15 = vmin.f32 %v50_v11, %v51_v13 }
  0xc3   :  { %108 = vpush %v52_v15  ;;  %v61_v16 = vrot.slane %v60_v14, 1 }
  0xc5   :  { %v62_v17 = vadd.f32 %v61_v16, %v60_v14 }
  0xc7   :  { %110 = vpush %v62_v17 }
  0xf4   :  { %s227_s1 = spop %108 }
  0xf5   :  { %s64_s6 = ssub.f32 0.01, %s227_s1 }
  0xf7   :  { %v67_v18 = vstv %s64_s6  ;;  %s65_s7 = smul.f32 2048.0, %s64_s6 }
  0xf8   :  { %v68_v19 = vadd.f32 %v67_v18, %v40_v0  ;;  %v69_v20 = vadd.f32 %v67_v18, %v41_v1  ;;  %s111_s8 = spop %110 }
  0xf9   :  { %s66_s9 = sadd.f32 %s111_s8, %s65_s7 }
  0xfa   :  { %119 = vrcp.f32 %v68_v19 }
  0xfb   :  { %121 = vrcp.f32 %v69_v20 }
 0x104   :  { %v120_v21 = vpop.eup %119 }
 0x105   :  { %v122_v22 = vpop.eup %121  ;;  %v72_v23 = vmul.f32 %v120_v21, %v68_v19 }
 0x106   :  { %v73_v24 = vmul.f32 %v122_v22, %v69_v20 }
 0x107   :  { %v74_v25 = vsub.f32 2.0, %v72_v23 }
 0x108   :  { %v75_v27 = vsub.f32 2.0, %v73_v24 }
 0x109   :  { %v76_v29 = vmul.f32 %v120_v21, %v74_v25 }
 0x10a   :  { %v77_v30 = vmul.f32 %v122_v22, %v75_v27 }
 0x10b   :  { %v78_v31 = vmul.f32 %v76_v29, %v42_v26 }
 0x10c   :  { %v79_v32 = vmul.f32 %v77_v30, %v43_v28 }
 0x10e   :  { %v80_v33 = vadd.f32 %v79_v32, %v78_v31 }
 0x110   :  { %81 = vadd.xlane.f32.xlu1 %v80_v33 }
 0x19d   :  { %v82_v34 = vpop.xlane.xlu1 %81 }
 0x19e   :  { %v83_v35 = vrot.slane %v82_v34, 4 }
 0x1a0   :  { %v84_v36 = vadd.f32 %v83_v35, %v82_v34 }
 0x1a2   :  { %v85_v37 = vrot.slane %v84_v36, 2 }
 0x1a4   :  { %v86_v38 = vadd.f32 %v85_v37, %v84_v36 }
 0x1a6   :  { %v87_v39 = vrot.slane %v86_v38, 1 }
 0x1a8   :  { %v88_v40 = vadd.f32 %v87_v39, %v86_v38 }
 0x1aa   :  { %112 = vpush %v88_v40 }
 0x1db   :  { %s113_s10 = spop %112 }
 0x1dc   :  { %s90_s11 = smul.f32 %s113_s10, %s66_s9 }
 0x1de   :  { %92 = sst [smem:[#allocation7]] %s90_s11 }
 0x1df   :  { %176 = shalt.err (!%p173_p4)
}
 0x1e0   :  { %s187_s19 = smov [#allocation7]  }
 0x1e1   :  { %100 = dma.smem_to_hbm %s187_s19, 16, %s244_s2, [#allocation4]  }
 0x1e2   :  { %181 = dma.done.wait [#allocation4], 16  }
 0x1e3   :  { %182 = vsyncadd [#allocation4], 4294967280 }
 0x1e4   :  { %104 = sfence }
 0x1e5   :  { %105 = vsyncpa [#allocation3], 1 }
 0x1e6   :  { %106 = vsyncpa [#allocation6], 1 }
 0x1e7   :  { %107 = vsyncpa [#allocation4], 1 }

</bundles_post_ra>
